<compile_context>
chip_gen: v7x
topology: tpu7x:2x2x1
jax: 0.10.0
libtpu: 0.0.40
codegen_flags: <defaults>
</compile_context>

<pallas_src>
import math
import jax
import jax.numpy as jnp
from jax.experimental import pallas as pl
from jax.experimental.pallas import tpu as pltpu

FEAT = 128  # hidden width == padded lane width


def dueling_dqn_kernel(x_ref, w1_ref, w2_ref, wh1_ref, wq_ref, bias_ref, out_ref):
    b = bias_ref[...]  # (8, 128) f32: rows 0..3 = b1, b2, bh1, bq(folded)

    # x = relu(layer1(x))  (NoisyLinear, noise folded into w1/b1)
    x = x_ref[...].astype(jnp.bfloat16)
    h1 = jnp.dot(x, w1_ref[...].astype(jnp.bfloat16),
                 preferred_element_type=jnp.float32) + b[0:1, :]
    h1 = jnp.maximum(h1, 0.0)

    # x = relu(layer2(x))
    h2 = jnp.dot(h1.astype(jnp.bfloat16), w2_ref[...],
                 preferred_element_type=jnp.float32) + b[1:2, :]
    h2 = jnp.maximum(h2, 0.0)

    # Fused heads, stage 1: [adv_hidden | val_hidden]
    hh = jnp.dot(h2.astype(jnp.bfloat16), wh1_ref[...],
                 preferred_element_type=jnp.float32) + b[2:3, :]
    hh = jnp.maximum(hh, 0.0)

    # Fused heads, stage 2 with the dueling combine folded into wq/bq:
    # lanes [0:nA] = val + (adv - adv.mean()), padded lanes = 0.
    q = jnp.dot(hh.astype(jnp.bfloat16), wq_ref[...],
                preferred_element_type=jnp.float32) + b[3:4, :]
    out_ref[...] = q.astype(out_ref.dtype)


def _round_up(v, m):
    return (v + m - 1) // m * m


def pack_params(p, n_observations, n_actions):
    """Pack effective params into lane-dense tiles with the dueling combine folded in."""
    nA = n_actions
    assert nA + 1 <= FEAT

    nobs_pad = _round_up(n_observations, 8)

    # layer1: pad input features to 8 rows only (kept f32, cast in-kernel; tiny tile).
    w1 = jnp.zeros((nobs_pad, FEAT), jnp.float32).at[:n_observations, :].set(p["w1"])
    w2 = p["w2"].astype(jnp.bfloat16)

    # Heads stage 1: columns [0:64] = advantage hidden, [64:128] = value hidden.
    wh1 = jnp.concatenate([p["wa1"], p["wv1"]], axis=1).astype(jnp.bfloat16)  # (128,128)
    bh1 = jnp.concatenate([p["ba1"], p["bv1"]], axis=1)                       # (1,128)

    # Heads stage 2 (block-diagonal): rows 0:64 -> adv lanes [0:nA], rows 64:128 -> lane nA.
    wh2 = jnp.zeros((FEAT, FEAT), jnp.float32)
    wh2 = wh2.at[:64, :nA].set(p["wa2"])
    wh2 = wh2.at[64:128, nA].set(p["wv2"][:, 0])
    bh2 = jnp.zeros((1, FEAT), jnp.float32)
    bh2 = bh2.at[0, :nA].set(p["ba2"][0])
    bh2 = bh2.at[0, nA].set(p["bv2"][0, 0])

    # Dueling combine matrix M: Q[:, k] = val + adv_k - mean(adv) for k < nA, 0 elsewhere.
    M = jnp.zeros((FEAT, FEAT), jnp.float32)
    M = M.at[:nA, :nA].set(jnp.eye(nA, dtype=jnp.float32) - 1.0 / nA)
    M = M.at[nA, :nA].set(1.0)

    wq = (wh2 @ M).astype(jnp.bfloat16)   # (128, 128)
    bq = bh2 @ M                          # (1, 128)

    # All biases packed into one (8,128) f32 tile.
    biases = jnp.zeros((8, FEAT), jnp.float32)
    biases = biases.at[0, :].set(p["b1"][0])
    biases = biases.at[1, :].set(p["b2"][0])
    biases = biases.at[2, :].set(bh1[0])
    biases = biases.at[3, :].set(bq[0])

    return dict(w1=w1, w2=w2, wh1=wh1, wq=wq, biases=biases)


def dueling_dqn_forward(x, packed, n_actions):
    """x: [B, n_obs] float32. packed: output of pack_params. Returns [B, n_actions] f32."""
    B, n_obs = x.shape
    nobs_pad = packed["w1"].shape[0]

    # Batch tile: big tiles for training batches; >= 2 grid steps when possible so
    # ("parallel",) can shard the batch across v7x's 2 TensorCores.
    if B >= 2048:
        TB = 1024
    elif B >= 16:
        TB = _round_up((B + 1) // 2, 8)
    else:
        TB = _round_up(max(B, 1), 8)
    B_pad = _round_up(B, TB)

    # Pad only batch (and feature dim to 8) — no 128-wide feature scatter.
    if B_pad == B and nobs_pad == n_obs:
        x_p = x.astype(jnp.float32)
    else:
        x_p = jnp.zeros((B_pad, nobs_pad), jnp.float32).at[:B, :n_obs].set(
            x.astype(jnp.float32))

    grid = (B_pad // TB,)
    const = lambda i: (0, 0)       # weights/biases stay VMEM-resident
    batch_map = lambda i: (i, 0)   # x / out tiled over the batch

    in_specs = [
        pl.BlockSpec((TB, nobs_pad), batch_map),     # x
        pl.BlockSpec((nobs_pad, FEAT), const),       # w1 (f32, cast in kernel)
        pl.BlockSpec((FEAT, FEAT), const),           # w2 (bf16)
        pl.BlockSpec((FEAT, FEAT), const),           # wh1 (bf16)
        pl.BlockSpec((FEAT, FEAT), const),           # wq (bf16, dueling folded)
        pl.BlockSpec((8, FEAT), const),              # packed biases (f32)
    ]
    out_spec = pl.BlockSpec((TB, FEAT), batch_map)

    out_padded = pl.pallas_call(
        dueling_dqn_kernel,
        out_shape=jax.ShapeDtypeStruct((B_pad, FEAT), jnp.bfloat16),
        grid=grid,
        in_specs=in_specs,
        out_specs=out_spec,
        compiler_params=pltpu.CompilerParams(
            dimension_semantics=("parallel",)),
    )(x_p, packed["w1"], packed["w2"], packed["wh1"], packed["wq"], packed["biases"])

    # Lane-dense bf16 kernel output; slice real Q-values + upcast in the wrapper (free).
    return out_padded[:B, :n_actions].astype(jnp.float32)


def init_params(key, n_observations, n_actions, sigma_init=0.005):
    """Deterministic parameter init mirroring the PyTorch module's shapes.

    NoisyLinear noise (epsilon) is sampled here and folded into the effective
    weights/biases, matching one forward() call of the torch module.
    All weights are returned transposed to (in, out); biases as (1, out).
    """
    keys = jax.random.split(key, 20)
    ki = iter(range(20))

    def uniform(k, shape, bound):
        return jax.random.uniform(k, shape, jnp.float32, -bound, bound)

    def noisy_linear(in_f, out_f):
        std = math.sqrt(3.0 / in_f)
        w = uniform(keys[next(ki)], (out_f, in_f), std)
        b = uniform(keys[next(ki)], (out_f,), std)
        eps_w = jax.random.normal(keys[next(ki)], (out_f, in_f), jnp.float32)
        eps_b = jax.random.normal(keys[next(ki)], (out_f,), jnp.float32)
        w_eff = w + sigma_init * eps_w
        b_eff = b + sigma_init * eps_b
        return w_eff.T, b_eff[None, :]

    def linear(in_f, out_f):
        bound = 1.0 / math.sqrt(in_f)
        w = uniform(keys[next(ki)], (out_f, in_f), bound)
        b = uniform(keys[next(ki)], (out_f,), bound)
        return w.T, b[None, :]

    p = {}
    p["w1"], p["b1"] = noisy_linear(n_observations, 128)
    p["w2"], p["b2"] = noisy_linear(128, 128)
    p["wa1"], p["ba1"] = linear(128, 64)
    p["wa2"], p["ba2"] = linear(64, n_actions)
    p["wv1"], p["bv1"] = linear(128, 64)
    p["wv2"], p["bv2"] = linear(64, 1)
    return p


def reference_forward(x, p):
    """Pure-JAX f32 reference for correctness checking (unpacked params)."""
    h1 = jnp.maximum(x @ p["w1"] + p["b1"], 0.0)
    h2 = jnp.maximum(h1 @ p["w2"] + p["b2"], 0.0)
    adv = jnp.maximum(h2 @ p["wa1"] + p["ba1"], 0.0) @ p["wa2"] + p["ba2"]
    val = jnp.maximum(h2 @ p["wv1"] + p["bv1"], 0.0) @ p["wv2"] + p["bv2"]
    return val + (adv - adv.mean(axis=1, keepdims=True))


if __name__ == "__main__":
    n_observations = 4   # CartPole observation dim
    n_actions = 2        # CartPole action dim
    batch = 2

    key = jax.random.PRNGKey(0)
    k_params, k_x = jax.random.split(key)

    params = init_params(k_params, n_observations, n_actions)
    packed = pack_params(params, n_observations, n_actions)
    x = jax.random.normal(k_x, (batch, n_observations), jnp.float32)

    out = dueling_dqn_forward(x, packed, n_actions)
    out = jax.block_until_ready(out)

    ref = reference_forward(x, params)
    assert out.shape == (batch, n_actions)
    # bf16 matmul operands + bf16 output store -> loosened tolerance vs f32 reference.
    assert jnp.allclose(out, ref, atol=5e-2, rtol=5e-2), (out, ref)

    print("KERNEL_OK")
</pallas_src>

<mosaic_0001>
module attributes {stable_mosaic.version = 11 : i64} {
  func.func @dueling_dqn_kernel(%arg0: i32, %arg1: memref<8x8xf32, #tpu.memory_space<vmem>>, %arg2: memref<8x128xf32, #tpu.memory_space<vmem>>, %arg3: memref<128x128xbf16, #tpu.memory_space<vmem>>, %arg4: memref<128x128xbf16, #tpu.memory_space<vmem>>, %arg5: memref<128x128xbf16, #tpu.memory_space<vmem>>, %arg6: memref<8x128xf32, #tpu.memory_space<vmem>>, %arg7: memref<8x128xbf16, #tpu.memory_space<vmem>>) attributes {dimension_semantics = [#tpu.dimension_semantics<parallel>], iteration_bounds = array<i64: 1>, scalar_prefetch = 0 : i64, scratch_operands = 0 : i64, tpu.core_type = #tpu.core_type<tc>, window_params = [{transform_indices = @transform_0, window_bounds = array<i64: 8, 8>}, {pipeline_mode = #tpu.pipeline_mode<synchronous>, transform_indices = @transform_1, window_bounds = array<i64: 8, 128>}, {pipeline_mode = #tpu.pipeline_mode<synchronous>, transform_indices = @transform_2, window_bounds = array<i64: 128, 128>}, {pipeline_mode = #tpu.pipeline_mode<synchronous>, transform_indices = @transform_3, window_bounds = array<i64: 128, 128>}, {pipeline_mode = #tpu.pipeline_mode<synchronous>, transform_indices = @transform_4, window_bounds = array<i64: 128, 128>}, {pipeline_mode = #tpu.pipeline_mode<synchronous>, transform_indices = @transform_5, window_bounds = array<i64: 8, 128>}, {transform_indices = @transform_6, window_bounds = array<i64: 8, 128>}]} {
    %c0 = arith.constant 0 : index
    %c0_0 = arith.constant 0 : index
    %0 = vector.load %arg6[%c0, %c0_0] : memref<8x128xf32, #tpu.memory_space<vmem>>, vector<8x128xf32>
    %c0_1 = arith.constant 0 : index
    %c0_2 = arith.constant 0 : index
    %1 = vector.load %arg1[%c0_1, %c0_2] : memref<8x8xf32, #tpu.memory_space<vmem>>, vector<8x8xf32>
    %2 = arith.truncf %1 : vector<8x8xf32> to vector<8x8xbf16>
    %c0_3 = arith.constant 0 : index
    %c0_4 = arith.constant 0 : index
    %3 = vector.load %arg2[%c0_3, %c0_4] : memref<8x128xf32, #tpu.memory_space<vmem>>, vector<8x128xf32>
    %4 = arith.truncf %3 : vector<8x128xf32> to vector<8x128xbf16>
    %cst = arith.constant dense<0.000000e+00> : vector<8x128xf32>
    %5 = tpu.matmul %2, %4, %cst {dimension_numbers = #tpu.dot_dimension_numbers<[1], [0], [0], [1], [0, 0, 1, 1], [], []>} : vector<8x8xbf16>, vector<8x128xbf16>, vector<8x128xf32> -> vector<8x128xf32>
    %6 = vector.extract_strided_slice %0 {offsets = [0, 0], sizes = [1, 128], strides = [1, 1]} : vector<8x128xf32> to vector<1x128xf32>
    %7 = vector.broadcast %6 : vector<1x128xf32> to vector<8x128xf32>
    %8 = arith.addf %5, %7 : vector<8x128xf32>
    %cst_5 = arith.constant 0.000000e+00 : f32
    %9 = vector.broadcast %cst_5 : f32 to vector<8x128xf32>
    %10 = arith.maximumf %8, %9 : vector<8x128xf32>
    %11 = arith.truncf %10 : vector<8x128xf32> to vector<8x128xbf16>
    %c0_6 = arith.constant 0 : index
    %c0_7 = arith.constant 0 : index
    %12 = vector.load %arg3[%c0_6, %c0_7] : memref<128x128xbf16, #tpu.memory_space<vmem>>, vector<128x128xbf16>
    %cst_8 = arith.constant dense<0.000000e+00> : vector<8x128xf32>
    %13 = tpu.matmul %11, %12, %cst_8 {dimension_numbers = #tpu.dot_dimension_numbers<[1], [0], [0], [1], [0, 0, 1, 1], [], []>} : vector<8x128xbf16>, vector<128x128xbf16>, vector<8x128xf32> -> vector<8x128xf32>
    %14 = vector.extract_strided_slice %0 {offsets = [1, 0], sizes = [1, 128], strides = [1, 1]} : vector<8x128xf32> to vector<1x128xf32>
    %15 = vector.broadcast %14 : vector<1x128xf32> to vector<8x128xf32>
    %16 = arith.addf %13, %15 : vector<8x128xf32>
    %cst_9 = arith.constant 0.000000e+00 : f32
    %17 = vector.broadcast %cst_9 : f32 to vector<8x128xf32>
    %18 = arith.maximumf %16, %17 : vector<8x128xf32>
    %19 = arith.truncf %18 : vector<8x128xf32> to vector<8x128xbf16>
    %c0_10 = arith.constant 0 : index
    %c0_11 = arith.constant 0 : index
    %20 = vector.load %arg4[%c0_10, %c0_11] : memref<128x128xbf16, #tpu.memory_space<vmem>>, vector<128x128xbf16>
    %cst_12 = arith.constant dense<0.000000e+00> : vector<8x128xf32>
    %21 = tpu.matmul %19, %20, %cst_12 {dimension_numbers = #tpu.dot_dimension_numbers<[1], [0], [0], [1], [0, 0, 1, 1], [], []>} : vector<8x128xbf16>, vector<128x128xbf16>, vector<8x128xf32> -> vector<8x128xf32>
    %22 = vector.extract_strided_slice %0 {offsets = [2, 0], sizes = [1, 128], strides = [1, 1]} : vector<8x128xf32> to vector<1x128xf32>
    %23 = vector.broadcast %22 : vector<1x128xf32> to vector<8x128xf32>
    %24 = arith.addf %21, %23 : vector<8x128xf32>
    %cst_13 = arith.constant 0.000000e+00 : f32
    %25 = vector.broadcast %cst_13 : f32 to vector<8x128xf32>
    %26 = arith.maximumf %24, %25 : vector<8x128xf32>
    %27 = arith.truncf %26 : vector<8x128xf32> to vector<8x128xbf16>
    %c0_14 = arith.constant 0 : index
    %c0_15 = arith.constant 0 : index
    %28 = vector.load %arg5[%c0_14, %c0_15] : memref<128x128xbf16, #tpu.memory_space<vmem>>, vector<128x128xbf16>
    %cst_16 = arith.constant dense<0.000000e+00> : vector<8x128xf32>
    %29 = tpu.matmul %27, %28, %cst_16 {dimension_numbers = #tpu.dot_dimension_numbers<[1], [0], [0], [1], [0, 0, 1, 1], [], []>} : vector<8x128xbf16>, vector<128x128xbf16>, vector<8x128xf32> -> vector<8x128xf32>
    %30 = vector.extract_strided_slice %0 {offsets = [3, 0], sizes = [1, 128], strides = [1, 1]} : vector<8x128xf32> to vector<1x128xf32>
    %31 = vector.broadcast %30 : vector<1x128xf32> to vector<8x128xf32>
    %32 = arith.addf %29, %31 : vector<8x128xf32>
    %33 = arith.truncf %32 : vector<8x128xf32> to vector<8x128xbf16>
    %c0_17 = arith.constant 0 : index
    %c0_18 = arith.constant 0 : index
    %34 = vector.load %arg7[%c0_17, %c0_18] : memref<8x128xbf16, #tpu.memory_space<vmem>>, vector<8x128xbf16>
    tpu.vector_store %arg7[%c0_17, %c0_18], %33 {strides = array<i32>} : memref<8x128xbf16, #tpu.memory_space<vmem>>, vector<8x128xbf16>,
    return
  }
  func.func @transform_0(%arg0: i32) -> (i32, i32) {
    %c0_i32 = arith.constant 0 : i32
    %c0_i32_0 = arith.constant 0 : i32
    return %arg0, %c0_i32 : i32, i32
  }
  func.func @transform_1(%arg0: i32) -> (i32, i32) {
    %c0_i32 = arith.constant 0 : i32
    %c0_i32_0 = arith.constant 0 : i32
    %c0_i32_1 = arith.constant 0 : i32
    return %c0_i32, %c0_i32_0 : i32, i32
  }
  func.func @transform_2(%arg0: i32) -> (i32, i32) {
    %c0_i32 = arith.constant 0 : i32
    %c0_i32_0 = arith.constant 0 : i32
    %c0_i32_1 = arith.constant 0 : i32
    return %c0_i32, %c0_i32_0 : i32, i32
  }
  func.func @transform_3(%arg0: i32) -> (i32, i32) {
    %c0_i32 = arith.constant 0 : i32
    %c0_i32_0 = arith.constant 0 : i32
    %c0_i32_1 = arith.constant 0 : i32
    return %c0_i32, %c0_i32_0 : i32, i32
  }
  func.func @transform_4(%arg0: i32) -> (i32, i32) {
    %c0_i32 = arith.constant 0 : i32
    %c0_i32_0 = arith.constant 0 : i32
    %c0_i32_1 = arith.constant 0 : i32
    return %c0_i32, %c0_i32_0 : i32, i32
  }
  func.func @transform_5(%arg0: i32) -> (i32, i32) {
    %c0_i32 = arith.constant 0 : i32
    %c0_i32_0 = arith.constant 0 : i32
    %c0_i32_1 = arith.constant 0 : i32
    return %c0_i32, %c0_i32_0 : i32, i32
  }
  func.func @transform_6(%arg0: i32) -> (i32, i32) {
    %c0_i32 = arith.constant 0 : i32
    %c0_i32_0 = arith.constant 0 : i32
    return %arg0, %c0_i32 : i32, i32
  }
}

</mosaic_0001>

<bundles_post_ra>
// kernel: tpu_custom_call.1
= control target key start
LH: loop header
LB: loop body
LE: loop exit
PB: predicated region body
PF: predicated region fallthrough
CT: control target
= control target key end

     0   :  { %11 = vsyncpa [#allocation3], 0  ;;  %s957_s0 = inlined_call_operand.hbm [shape: f32[8,8], index: 0, kind: input, shape index: {}]   ;;  %s958_s1 = inlined_call_operand.hbm [shape: f32[8,128], index: 1, kind: input, shape index: {}]   ;;  %s959_s2 = inlined_call_operand.hbm [shape: bf16[128,128], index: 2, kind: input, shape index: {}]   ;;  %s960_s3 = inlined_call_operand.hbm [shape: bf16[128,128], index: 3, kind: input, shape index: {}]   ;;  %s961_s4 = inlined_call_operand.hbm [shape: bf16[128,128], index: 4, kind: input, shape index: {}]   ;;  %s962_s5 = inlined_call_operand.vmem [shape: f32[8,128], index: 5, kind: input, shape index: {}]   ;;  %s963_s6 = inlined_call_operand.hbm [shape: bf16[8,128], index: 6, kind: output, shape index: {}]  }
   0x1   :  { %12 = vsyncpa [#allocation6], 0 }
   0x2   :  { %13 = vsyncpa [#allocation9], 0 }
   0x3   :  { %14 = vsyncpa [#allocation4], 0  ;;  %s789_s21 = smov [#allocation5]   ;;  %s649_s25 = scalar_lea.hbm %s958_s1, 128 }
   0x4   :  { %s31_s22 = sshll.u32 %s789_s21, 4  ;;  %p650_p0 = scmp.ne.s32.totalorder %s958_s1, %s649_s25  ;;  %s32_s22 = int_to_ptr.vmem [resolvable:$true] %s31_s22 }
   0x5   :  { %p653_p1 = scmp.lt.u32.totalorder %s649_s25, %s958_s1 }
   0x7   :  { %p655_p2 = pnand %p653_p1, %p650_p0 }
   0x9   :  { %658 = shalt.err (!%p655_p2)
}
   0xa   :  { %s659_s30 = scalar_lea.vmem %s32_s22, 128  ;;  %p664_p4 = scmp.lt.s32.totalorder %s32_s22, %s32_s22 }
   0xb   :  { %p660_p3 = scmp.ne.s32.totalorder %s32_s22, %s659_s30  ;;  %p665_p5 = scmp.lt.s32.totalorder %s659_s30, %s659_s30 }
   0xd   :  { %p666_p6 = por %p665_p5, %p664_p4 }
   0xf   :  { %p667_p7 = pnand %p666_p6, %p660_p3 }
  0x11   :  { %670 = shalt.err (!%p667_p7)
}
  0x12   :  { %34 = dma.hbm_to_vmem [thread:$0]  %s958_s1, 128, %s32_s22, [#allocation6]  }
  0x13   :  { %s790_s9 = smov [#allocation8]   ;;  %s791_s11 = smov [#allocation2]  }
  0x14   :  { %s52_s10 = sshll.u32 %s790_s9, 4  ;;  %s21_s12 = sshll.u32 %s791_s11, 4  ;;  %s53_s10 = int_to_ptr.vmem [resolvable:$true] %s52_s10  ;;  %s22_s12 = int_to_ptr.vmem [resolvable:$true] %s21_s12 }
  0x15   :  { %s671_s15 = scalar_lea.hbm %s960_s3, 1024 }
  0x16   :  { %p672_p8 = scmp.ne.s32.totalorder %s960_s3, %s671_s15  ;;  %p675_p9 = scmp.lt.u32.totalorder %s671_s15, %s960_s3 }
  0x18   :  { %p677_p10 = pnand %p675_p9, %p672_p8 }
  0x1a   :  { %680 = shalt.err (!%p677_p10)
}
  0x1b   :  { %s681_s1 = scalar_lea.vmem %s53_s10, 1024  ;;  %p686_p12 = scmp.lt.s32.totalorder %s53_s10, %s53_s10 }
  0x1c   :  { %p682_p11 = scmp.ne.s32.totalorder %s53_s10, %s681_s1  ;;  %p687_p13 = scmp.lt.s32.totalorder %s681_s1, %s681_s1 }
  0x1e   :  { %p688_p0 = por %p687_p13, %p686_p12 }
  0x20   :  { %p689_p1 = pnand %p688_p0, %p682_p11 }
  0x22   :  { %692 = shalt.err (!%p689_p1)
}
  0x23   :  { %s792_s20 = smov 64   ;;  %s793_s21 = smov 4  }
  0x24   :  { %58 = dma.hbm_to_vmem [thread:$0]  %s960_s3, 1024, %s53_s10, [#allocation9], %s792_s20, %s792_s20, %s793_s21  }
  0x25   :  { %s693_s26 = scalar_lea.hbm %s957_s0, 128 }
  0x26   :  { %p694_p2 = scmp.ne.s32.totalorder %s957_s0, %s693_s26  ;;  %p697_p3 = scmp.lt.u32.totalorder %s693_s26, %s957_s0 }
  0x28   :  { %p699_p4 = pnand %p697_p3, %p694_p2 }
  0x2a   :  { %702 = shalt.err (!%p699_p4)
}
  0x2b   :  { %s703_s7 = scalar_lea.vmem %s22_s12, 128  ;;  %p708_p6 = scmp.lt.s32.totalorder %s22_s12, %s22_s12 }
  0x2c   :  { %p704_p5 = scmp.ne.s32.totalorder %s22_s12, %s703_s7  ;;  %p709_p7 = scmp.lt.s32.totalorder %s703_s7, %s703_s7 }
  0x2e   :  { %p710_p8 = por %p709_p7, %p708_p6 }
  0x30   :  { %p711_p9 = pnand %p710_p8, %p704_p5 }
  0x32   :  { %714 = shalt.err (!%p711_p9)
}
  0x33   :  { %24 = dma.hbm_to_vmem [thread:$0]  %s957_s0, 128, %s22_s12, [#allocation3]  }
  0x34   :  { %s794_s9 = smov [#allocation7]   ;;  %s795_s11 = smov [#allocation10]  }
  0x35   :  { %s40_s10 = sshll.u32 %s794_s9, 4  ;;  %s64_s13 = sshll.u32 %s795_s11, 4  ;;  %s41_s10 = int_to_ptr.vmem [resolvable:$true] %s40_s10  ;;  %s65_s13 = int_to_ptr.vmem [resolvable:$true] %s64_s13 }
  0x36   :  { %s715_s16 = scalar_lea.hbm %s959_s2, 1024 }
  0x37   :  { %p716_p10 = scmp.ne.s32.totalorder %s959_s2, %s715_s16  ;;  %p719_p11 = scmp.lt.u32.totalorder %s715_s16, %s959_s2 }
  0x39   :  { %p721_p12 = pnand %p719_p11, %p716_p10 }
  0x3b   :  { %724 = shalt.err (!%p721_p12)
}
  0x3c   :  { %s725_s0 = scalar_lea.vmem %s41_s10, 1024  ;;  %p730_p0 = scmp.lt.s32.totalorder %s41_s10, %s41_s10 }
  0x3d   :  { %p726_p13 = scmp.ne.s32.totalorder %s41_s10, %s725_s0  ;;  %p731_p1 = scmp.lt.s32.totalorder %s725_s0, %s725_s0 }
  0x3f   :  { %p732_p2 = por %p731_p1, %p730_p0 }
  0x41   :  { %p733_p3 = pnand %p732_p2, %p726_p13 }
  0x43   :  { %736 = shalt.err (!%p733_p3)
}
  0x44   :  { %46 = dma.hbm_to_vmem [thread:$0]  %s959_s2, 1024, %s41_s10, [#allocation6], %s792_s20, %s792_s20, %s793_s21  }
  0x45   :  { %s737_s25 = scalar_lea.hbm %s961_s4, 1024 }
  0x46   :  { %p738_p4 = scmp.ne.s32.totalorder %s961_s4, %s737_s25  ;;  %p741_p5 = scmp.lt.u32.totalorder %s737_s25, %s961_s4 }
  0x48   :  { %p743_p6 = pnand %p741_p5, %p738_p4 }
  0x4a   :  { %746 = shalt.err (!%p743_p6)
}
  0x4b   :  { %s747_s30 = scalar_lea.vmem %s65_s13, 1024  ;;  %p752_p8 = scmp.lt.s32.totalorder %s65_s13, %s65_s13 }
  0x4c   :  { %p748_p7 = scmp.ne.s32.totalorder %s65_s13, %s747_s30  ;;  %p753_p9 = scmp.lt.s32.totalorder %s747_s30, %s747_s30 }
  0x4e   :  { %p754_p10 = por %p753_p9, %p752_p8 }
  0x50   :  { %p755_p11 = pnand %p754_p10, %p748_p7 }
  0x52   :  { %758 = shalt.err (!%p755_p11)
}
  0x53   :  { %70 = dma.hbm_to_vmem [thread:$0]  %s961_s4, 1024, %s65_s13, [#allocation9], %s792_s20, %s792_s20, %s793_s21  }
  0x54   :  { %781 = dma.done.wait [#allocation3], 128  }
  0x55   :  { %782 = vsyncadd [#allocation3], 4294967168 }
  0x56   :  { %783 = dma.done.wait [#allocation6], 1152  }
  0x57   :  { %784 = vsyncadd [#allocation6], 4294966144 }
  0x58   :  { %785 = dma.done.wait [#allocation9], 2048  }
  0x59   :  { %786 = vsyncadd [#allocation9], 4294965248  ;;  %v796_v0 = vmov 0.0   ;;  %vm797_vm0 = vmmov 0   ;;  %v92_v1 = vld [vmem:[#allocation5] sm:$0xff]  ;;  %vm102_vm1 = vcmask 1043456   ;;  %v94_v20 = vlaneseq }
  0x5a   :  { %549 = vmatprep.subr.bf16.mxu0 %v796_v0  ;;  %551 = vmatprep.mubr.msk.bf16.mxu0 %vm797_vm0, %v796_v0  ;;  %v90_v2 = vld [vmem:[#allocation2] sm:$0xff]  ;;  %v93_v3 = vpack.c.bf16 %v92_v1, %v92_v1  ;;  %v625_v4 = vld [vmem:[#allocation7] sm:$0xff]   ;;  %v626_v7 = vld [vmem:[#allocation7 + $0x8] sm:$0xff]   ;;  %vm98_vm2 = vcmask 64512  }
  0x5b   :  { %555 = vmatprep.subr.bf16.mxu1 %v796_v0  ;;  %571 = vmatprep.mubr.msk.bf16.mxu1 %vm797_vm0, %v796_v0  ;;  %v91_v6 = vpack.c.bf16 %v90_v2, %v90_v2  ;;  %v627_v8 = vld [vmem:[#allocation7 + $0x10] sm:$0xff]   ;;  %v628_v9 = vld [vmem:[#allocation7 + $0x18] sm:$0xff]   ;;  %v629_v10 = vld [vmem:[#allocation7 + $0x20] sm:$0xff]   ;;  %v926_v21 = vshrl.u32 %v94_v20, 7 }
  0x5c   :  { %v104_v5 = vsel %vm102_vm1, %v93_v3, 0  ;;  %556 = vmatpush3.bf16.msra.mxu1 %v625_v4  ;;  %v630_v11 = vld [vmem:[#allocation7 + $0x28] sm:$0xff]   ;;  %v631_v12 = vld [vmem:[#allocation7 + $0x30] sm:$0xff]   ;;  %v632_v13 = vld [vmem:[#allocation7 + $0x38] sm:$0xff]  }
  0x5d   :  { %550 = vmatpush3.bf16.msra.mxu0 %v104_v5  ;;  %557 = vmatprep.subr.bf16.mxu1 %v796_v0  ;;  %v633_v14 = vld [vmem:[#allocation8] sm:$0xff]   ;;  %v634_v15 = vld [vmem:[#allocation8 + $0x8] sm:$0xff]   ;;  %v635_v16 = vld [vmem:[#allocation8 + $0x10] sm:$0xff]   ;;  %v96_v22 = vsub.s32 0, %v926_v21  ;;  %v166_v40 = vsub.s32 1, %v926_v21  ;;  %v276_v51 = vsub.s32 2, %v926_v21 }
  0x5e   :  { %575 = vmatprep.subr.bf16.mxu0 %v796_v0  ;;  %v636_v17 = vld [vmem:[#allocation8 + $0x18] sm:$0xff]   ;;  %v637_v18 = vld [vmem:[#allocation8 + $0x20] sm:$0xff]   ;;  %v638_v19 = vld [vmem:[#allocation8 + $0x28] sm:$0xff]   ;;  %v386_v60 = vsub.s32 3, %v926_v21 }
  0x5f   :  { %v89_v23 = vld [vmem:[%s962_s5] sm:$0xff]  ;;  %v640_v33 = vld [vmem:[#allocation8 + $0x38] sm:$0xff]   ;;  %v641_v34 = vld [vmem:[#allocation10] sm:$0xff]   ;;  %s798_s5 = smov [#allocation11]  }
  0x60   :  { %552 = vmatmul.mubr.msk.bf16.vlgmr.msra.gmra.mrb[0].mxu0 %vm98_vm2, %v91_v6  ;;  %558 = vmatpush3.bf16.msra.mxu1 %v626_v7  ;;  %v97_v24 = vrot.slane %v89_v23, %v96_v22  ;;  %v639_v32 = vld [vmem:[#allocation8 + $0x30] sm:$0xff]   ;;  %v642_v35 = vld [vmem:[#allocation10 + $0x8] sm:$0xff]   ;;  %v644_v37 = vld [vmem:[#allocation10 + $0x18] sm:$0xff]   ;;  %v167_v41 = vrot.slane %v89_v23, %v166_v40  ;;  %v277_v52 = vrot.slane %v89_v23, %v276_v51  ;;  %s484_s21 = sshll.u32 %s798_s5, 4  ;;  %s485_s21 = int_to_ptr.vmem [resolvable:$true] %s484_s21 }
  0x61   :  { %559 = vmatprep.subr.bf16.mxu1 %v796_v0  ;;  %591 = vmatprep.mubr.msk.bf16.mxu0 %vm797_vm0, %v796_v0  ;;  %v643_v36 = vld [vmem:[#allocation10 + $0x10] sm:$0xff]   ;;  %v645_v38 = vld [vmem:[#allocation10 + $0x20] sm:$0xff]   ;;  %v646_v39 = vld [vmem:[#allocation10 + $0x28] sm:$0xff]   ;;  %v387_v61 = vrot.slane %v89_v23, %v386_v60  ;;  %s759_s3 = scalar_lea.vmem %s485_s21, 64  ;;  %p764_p13 = scmp.lt.s32.totalorder %s485_s21, %s485_s21 }
  0x62   :  { %576 = vmatpush3.bf16.msra.mxu0 %v633_v14  ;;  %v647_v49 = vld [vmem:[#allocation10 + $0x30] sm:$0xff]   ;;  %v648_v50 = vld [vmem:[#allocation10 + $0x38] sm:$0xff]   ;;  %p760_p12 = scmp.ne.s32.totalorder %s485_s21, %s759_s3  ;;  %p765_p0 = scmp.lt.s32.totalorder %s759_s3, %s759_s3 }
  0x63   :  { %577 = vmatprep.subr.bf16.mxu0 %v796_v0 }
  0x64   :  { %560 = vmatpush3.bf16.msra.mxu1 %v627_v8  ;;  %p766_p1 = por %p765_p0, %p764_p13 }
  0x65   :  { %561 = vmatprep.subr.bf16.mxu1 %v796_v0 }
  0x66   :  { %578 = vmatpush3.bf16.msra.mxu0 %v634_v15  ;;  %p767_p2 = pnand %p766_p1, %p760_p12 }
  0x67   :  { %579 = vmatprep.subr.bf16.mxu0 %v796_v0 }
  0x68   :  { %562 = vmatpush3.bf16.msra.mxu1 %v628_v9 }
  0x69   :  { %563 = vmatprep.subr.bf16.mxu1 %v796_v0 }
  0x6a   :  { %580 = vmatpush3.bf16.msra.mxu0 %v635_v16 }
  0x6b   :  { %581 = vmatprep.subr.bf16.mxu0 %v796_v0 }
  0x6c   :  { %564 = vmatpush3.bf16.msra.mxu1 %v629_v10 }
  0x6d   :  { %565 = vmatprep.subr.bf16.mxu1 %v796_v0 }
  0x6e   :  { %582 = vmatpush3.bf16.msra.mxu0 %v636_v17 }
  0x6f   :  { %583 = vmatprep.subr.bf16.mxu0 %v796_v0 }
  0x70   :  { %566 = vmatpush3.bf16.msra.mxu1 %v630_v11 }
  0x71   :  { %567 = vmatprep.subr.bf16.mxu1 %v796_v0 }
  0x72   :  { %584 = vmatpush3.bf16.msra.mxu0 %v637_v18 }
  0x73   :  { %585 = vmatprep.subr.bf16.mxu0 %v796_v0 }
  0x74   :  { %568 = vmatpush3.bf16.msra.mxu1 %v631_v12 }
  0x75   :  { %569 = vmatprep.subr.bf16.mxu1 %v796_v0 }
  0x76   :  { %586 = vmatpush3.bf16.msra.mxu0 %v638_v19 }
  0x77   :  { %587 = vmatprep.subr.bf16.mxu0 %v796_v0 }
  0x78   :  { %570 = vmatpush3.bf16.msra.mxu1 %v632_v13 }
  0x79   :  { %595 = vmatprep.subr.bf16.mxu1 %v796_v0 }
  0x7a   :  { %588 = vmatpush3.bf16.msra.mxu0 %v639_v32 }
  0x7b   :  { %589 = vmatprep.subr.bf16.mxu0 %v796_v0 }
  0x7e   :  { %590 = vmatpush3.bf16.msra.mxu0 %v640_v33 }
 0x133   :  { %v140_v25 = vpop.f32.mrb[0].mxu0 }
 0x134   :  { %v141_v26 = vadd.f32 %v140_v25, %v97_v24  ;;  %v553_v27 = vpop.f32.mrb[1].mxu0 }
 0x135   :  { %v143_v28 = vpop.f32.mrb[2].mxu0 }
 0x136   :  { %v146_v29 = vmax.f32 %v141_v26, 0.0  ;;  %v554_v30 = vpop.f32.mrb[3].mxu0 }
 0x138   :  { %v147_v31 = vpack.c.bf16 %v146_v29, %v146_v29 }
 0x13a   :  { %572 = vmatmul.mubr.bf16.vlgmr.msra.gmra.mrb[0].mxu1 %v147_v31 }
 0x13b   :  { %611 = vmatprep.mubr.msk.bf16.mxu1 %vm797_vm0, %v796_v0  ;;  %596 = vmatpush3.bf16.msra.mxu1 %v641_v34 }
 0x13c   :  { %597 = vmatprep.subr.bf16.mxu1 %v796_v0 }
 0x13f   :  { %598 = vmatpush3.bf16.msra.mxu1 %v642_v35 }
 0x140   :  { %599 = vmatprep.subr.bf16.mxu1 %v796_v0 }
 0x143   :  { %600 = vmatpush3.bf16.msra.mxu1 %v643_v36 }
 0x144   :  { %601 = vmatprep.subr.bf16.mxu1 %v796_v0 }
 0x147   :  { %602 = vmatpush3.bf16.msra.mxu1 %v644_v37 }
 0x148   :  { %603 = vmatprep.subr.bf16.mxu1 %v796_v0 }
 0x14b   :  { %604 = vmatpush3.bf16.msra.mxu1 %v645_v38 }
 0x14c   :  { %605 = vmatprep.subr.bf16.mxu1 %v796_v0 }
 0x14f   :  { %606 = vmatpush3.bf16.msra.mxu1 %v646_v39 }
 0x150   :  { %607 = vmatprep.subr.bf16.mxu1 %v796_v0 }
 0x153   :  { %608 = vmatpush3.bf16.msra.mxu1 %v647_v49 }
 0x154   :  { %609 = vmatprep.subr.bf16.mxu1 %v796_v0 }
 0x157   :  { %610 = vmatpush3.bf16.msra.mxu1 %v648_v50 }
 0x20d   :  { %v250_v42 = vpop.f32.mrb[0].mxu1 }
 0x20e   :  { %v251_v43 = vadd.f32 %v250_v42, %v167_v41  ;;  %v573_v44 = vpop.f32.mrb[1].mxu1 }
 0x20f   :  { %v253_v45 = vpop.f32.mrb[2].mxu1 }
 0x210   :  { %v256_v46 = vmax.f32 %v251_v43, 0.0  ;;  %v574_v47 = vpop.f32.mrb[3].mxu1 }
 0x212   :  { %v257_v48 = vpack.c.bf16 %v256_v46, %v256_v46 }
 0x214   :  { %592 = vmatmul.mubr.bf16.vlgmr.msra.gmra.mrb[4].mxu0 %v257_v48 }
 0x2e7   :  { %v360_v53 = vpop.f32.mrb[4].mxu0 }
 0x2e8   :  { %v361_v54 = vadd.f32 %v360_v53, %v277_v52  ;;  %v593_v55 = vpop.f32.mrb[5].mxu0 }
 0x2e9   :  { %v363_v56 = vpop.f32.mrb[6].mxu0 }
 0x2ea   :  { %v366_v57 = vmax.f32 %v361_v54, 0.0  ;;  %v594_v58 = vpop.f32.mrb[7].mxu0 }
 0x2ec   :  { %v367_v59 = vpack.c.bf16 %v366_v57, %v366_v57 }
 0x2ee   :  { %612 = vmatmul.mubr.bf16.vlgmr.msra.gmra.mrb[4].mxu1 %v367_v59 }
 0x3c1   :  { %v470_v62 = vpop.f32.mrb[4].mxu1 }
 0x3c2   :  { %v471_v63 = vadd.f32 %v470_v62, %v387_v61  ;;  %v613_v0 = vpop.f32.mrb[5].mxu1 }
 0x3c3   :  { %v473_v1 = vpop.f32.mrb[6].mxu1 }
 0x3c4   :  { %v476_v2 = vpack.c.bf16 %v471_v63, %v471_v63  ;;  %v614_v3 = vpop.f32.mrb[7].mxu1 }
 0x3c6   :  { %477 = vst [vmem:[#allocation11] sm:$0xf] %v476_v2 }
 0x3c7   :  { %770 = shalt.err (!%p767_p2)
}
 0x3c8   :  { %s771_s10 = scalar_lea.hbm %s963_s6, 64 }
 0x3c9   :  { %p772_p3 = scmp.ne.s32.totalorder %s963_s6, %s771_s10  ;;  %p775_p4 = scmp.lt.u32.totalorder %s771_s10, %s963_s6 }
 0x3cb   :  { %p777_p5 = pnand %p775_p4, %p772_p3 }
 0x3cd   :  { %780 = shalt.err (!%p777_p5)
}
 0x3ce   :  { %487 = dma.vmem_to_hbm [thread:$0]  %s485_s21, 64, %s963_s6, [#allocation4]  }
 0x3cf   :  { %787 = dma.done.wait [#allocation4], 64  }
 0x3d0   :  { %788 = vsyncadd [#allocation4], 4294967232 }
 0x3d1   :  { %491 = vsyncpa [#allocation3], 1 }
 0x3d2   :  { %492 = vsyncpa [#allocation6], 1 }
 0x3d3   :  { %493 = vsyncpa [#allocation9], 1 }
 0x3d4   :  { %494 = vsyncpa [#allocation4], 1 }

</bundles_post_ra>
